<compile_context>
chip_gen: v6e
topology: v6e:2x2x1
jax: 0.10.0
libtpu: 0.0.40
codegen_flags: <defaults>
</compile_context>

<pallas_src>
import functools

import jax
import jax.numpy as jnp
from jax.experimental import pallas as pl
from jax.experimental.pallas import tpu as pltpu

BN_EPS = 1e-5
LANE = 128
SUBLANE_BF16 = 16


def _round_up(x, m):
    return (x + m - 1) // m * m


# ---------------------------------------------------------------------------
# Pass 1: tiled conv-as-matmul (transposed layout) + per-tile channel stats
# ---------------------------------------------------------------------------
def _conv_stats_kernel(p_ref, w_ref, y_ref, stat_ref):
    """One column tile of the transposed im2col matmul + per-tile channel stats.

    p_ref:    (K_pad, tile_m)  bf16  im2col patches tile (M on lanes)
    w_ref:    (C_pad, K_pad)   bf16  folded weights (resident, constant index)
    y_ref:    (C_pad, tile_m)  bf16  conv output tile (lane-dense over M)
    stat_ref: (C_pad, 2)       f32   col 0 = sum, col 1 = sum of squares (this tile)
    """
    y = jnp.dot(w_ref[...], p_ref[...], preferred_element_type=jnp.float32)
    y_ref[...] = y.astype(y_ref.dtype)            # bf16 intermediate to HBM
    # f32 statistics (lane reductions -> XLU; padded tail columns are exactly 0).
    stat_ref[:, 0:1] = jnp.sum(y, axis=1, keepdims=True)
    stat_ref[:, 1:2] = jnp.sum(y * y, axis=1, keepdims=True)


# ---------------------------------------------------------------------------
# Pass 2: tiled affine normalize (scale/shift precomputed in wrapper) + ReLU
# ---------------------------------------------------------------------------
def _bn_relu_kernel(ss_ref, y_ref, o_ref):
    """o = relu(y * scale + shift) for one column tile.

    ss_ref: (C_pad, 2)      f32  col 0 = scale = gamma*rsqrt(var+eps),
                                 col 1 = shift = beta - mean*scale
    y_ref:  (C_pad, tile_m) bf16 conv output tile
    o_ref:  (C_pad, tile_m) f32  output tile
    """
    y = y_ref[...].astype(jnp.float32)
    o_ref[...] = jnp.maximum(y * ss_ref[:, 0:1] + ss_ref[:, 1:2], 0.0)


# ---------------------------------------------------------------------------
# Generation-aware tile / VMEM-limit selection
# ---------------------------------------------------------------------------
def _pick_tiling(M, K_pad, C_pad, itemsize):
    """Pick (tile_m, vmem_limit_bytes) for the current TPU generation."""
    try:
        vmem_cap = pltpu.get_tpu_info().vmem_capacity_bytes
    except Exception:                                  # unknown / emulated backend
        vmem_cap = 64 * 1024 * 1024
    # v5e/v6e: 128 MiB physical VMEM -> raise the scoped limit well past the
    # 32 MiB default; v7x: 64 MiB physical -> stay around 44 MiB.
    vmem_limit = (80 << 20) if vmem_cap >= (100 << 20) else (44 << 20)
    budget = int(vmem_limit * 0.6)                     # headroom for compiler scratch

    def working_set(tile):
        p1 = (2 * K_pad * tile * itemsize              # patches (double buffered)
              + 2 * C_pad * tile * itemsize            # bf16 conv intermediate
              + 2 * C_pad * K_pad * itemsize           # resident weights (2 bufs)
              + 2 * C_pad * 2 * 4)                     # per-tile stats
        p2 = (2 * C_pad * tile * itemsize              # bf16 conv intermediate read
              + 2 * C_pad * tile * 4                   # f32 output
              + C_pad * 2 * 4)                         # scale/shift
        return max(p1, p2)

    tile_m = 128
    for cand in (1024, 512, 256, 128):                 # largest tile that fits wins
        if working_set(cand) <= budget:
            tile_m = cand
            break
    # Keep >= 2 grid steps so both TensorCores of a v7x chip get work.
    tile_m = min(tile_m, max(128, _round_up(-(-M // 2), 128)))
    return tile_m, vmem_limit


# ---------------------------------------------------------------------------
# Wrapper (PyTorch-facing: NCHW activations / OIHW weights)
# ---------------------------------------------------------------------------
@functools.partial(
    jax.jit,
    static_argnames=("stride", "padding", "dilation", "compute_dtype",
                     "tile_m", "vmem_limit_bytes"))
def _conv_bn_relu_impl(x_nchw, weight_oihw, gamma, beta, *, stride, padding,
                       dilation, compute_dtype, tile_m, vmem_limit_bytes):
    N, Cin, H, W = x_nchw.shape
    Cout, Cin_w, KH, KW = weight_oihw.shape
    assert Cin == Cin_w

    Ho = (H + 2 * padding - dilation * (KH - 1) - 1) // stride + 1
    Wo = (W + 2 * padding - dilation * (KW - 1) - 1) // stride + 1

    M = N * Ho * Wo                       # flattened output positions (lane axis)
    K = KH * KW * Cin                     # folded contraction dim (sublane axis)
    M_pad = _round_up(max(M, tile_m), tile_m)
    K_pad = _round_up(K, SUBLANE_BF16)
    C_pad = _round_up(Cout, SUBLANE_BF16)
    num_tiles = M_pad // tile_m

    # ---- layout plumbing (plain JAX glue, all in bf16) ----
    x_c = x_nchw.astype(compute_dtype)
    x_sp = jnp.pad(x_c, ((0, 0), (0, 0), (padding, padding), (padding, padding)))
    taps = []
    for kh in range(KH):
        for kw in range(KW):
            h0, w0 = kh * dilation, kw * dilation
            taps.append(x_sp[:, :, h0:h0 + (Ho - 1) * stride + 1:stride,
                             w0:w0 + (Wo - 1) * stride + 1:stride])
    pt = jnp.stack(taps, axis=0)                         # (KH*KW, N, Cin, Ho, Wo)
    pt = jnp.transpose(pt, (0, 2, 1, 3, 4))              # (KH*KW, Cin, N, Ho, Wo)
    patches_t = pt.reshape(K, M)                         # K on sublanes, M on lanes
    patches_t = jnp.pad(patches_t, ((0, K_pad - K), (0, M_pad - M)))

    # weights -> (Cout, KH*KW*Cin) with the same K ordering, zero-padded.
    w_t = jnp.transpose(weight_oihw, (0, 2, 3, 1)).reshape(Cout, K)
    w_t = jnp.pad(w_t, ((0, C_pad - Cout), (0, K_pad - K))).astype(compute_dtype)

    itemsize = jnp.dtype(compute_dtype).itemsize
    cparams = pltpu.CompilerParams(
        dimension_semantics=("parallel",),
        vmem_limit_bytes=vmem_limit_bytes)

    # ---- Pass 1: conv (transposed im2col matmul) + per-tile channel stats ----
    cost1 = pl.CostEstimate(
        flops=2 * M_pad * K_pad * C_pad,
        transcendentals=0,
        bytes_accessed=(K_pad * M_pad * itemsize + C_pad * K_pad * itemsize
                        + C_pad * M_pad * itemsize + num_tiles * C_pad * 2 * 4))
    conv_t, tile_stats = pl.pallas_call(
        _conv_stats_kernel,
        grid=(num_tiles,),
        in_specs=[
            pl.BlockSpec((K_pad, tile_m), lambda i: (0, i)),      # patches tile
            pl.BlockSpec((C_pad, K_pad), lambda i: (0, 0)),       # weights (resident)
        ],
        out_specs=[
            pl.BlockSpec((C_pad, tile_m), lambda i: (0, i)),      # bf16 conv tile
            pl.BlockSpec((None, C_pad, 2), lambda i: (i, 0, 0)),  # per-tile stats
        ],
        out_shape=[
            jax.ShapeDtypeStruct((C_pad, M_pad), compute_dtype),
            jax.ShapeDtypeStruct((num_tiles, C_pad, 2), jnp.float32),
        ],
        compiler_params=cparams,
        cost_estimate=cost1,
    )(patches_t, w_t)

    # ---- tiny cross-tile reduce + BN affine fold (wrapper glue on (C,) vectors) ----
    # Zero-padded tail columns contribute exactly 0 to sum/sum_sq, so dividing by the
    # true row count M gives the correct train-mode (biased) batch statistics.
    stats = jnp.sum(tile_stats, axis=0)                   # (C_pad, 2) f32
    mean = stats[:, 0] / M
    # E[x^2]-E[x]^2 in f32, guarded against cancellation.
    # TODO(synk): use a centered second pass if |mean| >> std channels are expected.
    var = jnp.maximum(stats[:, 1] / M - mean * mean, 0.0)
    inv_std = jax.lax.rsqrt(var + BN_EPS)
    gamma_p = jnp.pad(gamma.astype(jnp.float32), (0, C_pad - Cout))
    beta_p = jnp.pad(beta.astype(jnp.float32), (0, C_pad - Cout))
    scale = gamma_p * inv_std
    shift = beta_p - mean * scale
    ss = jnp.stack([scale, shift], axis=1)                # (C_pad, 2) f32
    # TODO(synk): PyTorch BatchNorm2d (train mode) also updates running_mean /
    # running_var; those module buffers are not modeled here (activation output only).

    # ---- Pass 2: y*scale + shift, ReLU — pure FMA+max stream, lane-dense ----
    cost2 = pl.CostEstimate(
        flops=3 * M_pad * C_pad,
        transcendentals=0,
        bytes_accessed=C_pad * M_pad * (itemsize + 4) + C_pad * 2 * 4)
    out_t = pl.pallas_call(
        _bn_relu_kernel,
        grid=(num_tiles,),
        in_specs=[
            pl.BlockSpec((C_pad, 2), lambda i: (0, 0)),           # scale/shift
            pl.BlockSpec((C_pad, tile_m), lambda i: (0, i)),      # bf16 conv tile
        ],
        out_specs=pl.BlockSpec((C_pad, tile_m), lambda i: (0, i)),
        out_shape=jax.ShapeDtypeStruct((C_pad, M_pad), jnp.float32),
        compiler_params=cparams,
        cost_estimate=cost2,
    )(ss, conv_t)

    # Padded tail columns / channels beyond (Cout, M) are garbage; slice before use.
    out = out_t[:Cout, :M].reshape(Cout, N, Ho, Wo)
    return jnp.transpose(out, (1, 0, 2, 3)).astype(x_nchw.dtype)   # back to NCHW


def conv_bn_relu(x_nchw, weight_oihw, gamma, beta, *, stride=1, padding=0,
                 dilation=1, compute_dtype=jnp.bfloat16):
    """Forward pass equivalent to the PyTorch conv_bn_relu module
    (Conv2d(bias=False) -> BatchNorm2d with train-mode batch stats -> ReLU)."""
    N, Cin, H, W = x_nchw.shape
    Cout, _, KH, KW = weight_oihw.shape
    Ho = (H + 2 * padding - dilation * (KH - 1) - 1) // stride + 1
    Wo = (W + 2 * padding - dilation * (KW - 1) - 1) // stride + 1
    M = N * Ho * Wo
    K_pad = _round_up(KH * KW * Cin, SUBLANE_BF16)
    C_pad = _round_up(Cout, SUBLANE_BF16)
    tile_m, vmem_limit = _pick_tiling(M, K_pad, C_pad,
                                      jnp.dtype(compute_dtype).itemsize)
    return _conv_bn_relu_impl(
        x_nchw, weight_oihw, gamma, beta, stride=stride, padding=padding,
        dilation=dilation, compute_dtype=compute_dtype, tile_m=tile_m,
        vmem_limit_bytes=vmem_limit)


# ---------------------------------------------------------------------------
# Pure-JAX reference (conv + train-mode BN + ReLU) for correctness checking
# ---------------------------------------------------------------------------
def _reference(x_nchw, weight_oihw, gamma, beta, *, stride, padding, dilation):
    y = jax.lax.conv_general_dilated(
        x_nchw, weight_oihw,
        window_strides=(stride, stride),
        padding=[(padding, padding), (padding, padding)],
        rhs_dilation=(dilation, dilation),
        dimension_numbers=("NCHW", "OIHW", "NCHW"),
        precision=jax.lax.Precision.HIGHEST,
        preferred_element_type=jnp.float32,
    )
    mean = jnp.mean(y, axis=(0, 2, 3), keepdims=True)
    var = jnp.mean((y - mean) ** 2, axis=(0, 2, 3), keepdims=True)  # biased (train BN)
    y = (y - mean) * jax.lax.rsqrt(var + BN_EPS)
    y = y * gamma.reshape(1, -1, 1, 1) + beta.reshape(1, -1, 1, 1)
    return jnp.maximum(y, 0.0)


if __name__ == "__main__":
    # Module config: Conv2d(in=4, out=8, k=3, stride=1, pad=1, dil=1, bias=False) + BN + ReLU
    batch, in_channels, out_channels = 2, 4, 8
    H = W = 16
    kernel_size, stride, padding, dilation = 3, 1, 1, 1

    key = jax.random.PRNGKey(0)
    kx, kw = jax.random.split(key)
    x = jax.random.normal(kx, (batch, in_channels, H, W), dtype=jnp.float32)
    weight = 0.1 * jax.random.normal(
        kw, (out_channels, in_channels, kernel_size, kernel_size), dtype=jnp.float32)
    gamma = jnp.ones((out_channels,), dtype=jnp.float32)   # BatchNorm2d default init
    beta = jnp.zeros((out_channels,), dtype=jnp.float32)

    out = conv_bn_relu(x, weight, gamma, beta,
                       stride=stride, padding=padding, dilation=dilation)
    out = jax.block_until_ready(out)

    ref_f32 = _reference(x, weight, gamma, beta,
                         stride=stride, padding=padding, dilation=dilation)
    # Reference with operands pre-rounded to bf16 (matches the MXU operand precision).
    ref_matched = _reference(
        x.astype(jnp.bfloat16).astype(jnp.float32),
        weight.astype(jnp.bfloat16).astype(jnp.float32),
        gamma, beta, stride=stride, padding=padding, dilation=dilation)

    assert out.shape == ref_f32.shape == (batch, out_channels, H, W)
    # Check vs the precision-matched reference (validates kernel math; slack covers
    # the bf16 rounding of the stored conv intermediate).
    assert jnp.allclose(out, ref_matched, atol=2e-2, rtol=2e-2), \
        "mismatch vs bf16-operand-matched reference"
    # Loose check vs the full-f32 reference (bf16 operand + intermediate rounding).
    assert jnp.allclose(out, ref_f32, atol=5e-2, rtol=5e-2), \
        "mismatch vs f32 reference"

    print("KERNEL_OK")
</pallas_src>

<mosaic_0001>
module attributes {stable_mosaic.version = 11 : i64} {
  func.func @_conv_stats_kernel(%arg0: i32, %arg1: memref<48x256xbf16, #tpu.memory_space<vmem>>, %arg2: memref<16x48xbf16, #tpu.memory_space<vmem>>, %arg3: memref<16x256xbf16, #tpu.memory_space<vmem>>, %arg4: memref<1x16x2xf32, #tpu.memory_space<vmem>>) attributes {dimension_semantics = [#tpu.dimension_semantics<parallel>], iteration_bounds = array<i64: 2>, scalar_prefetch = 0 : i64, scratch_operands = 0 : i64, tpu.core_type = #tpu.core_type<tc>, window_params = [{transform_indices = @transform_0, window_bounds = array<i64: 48, 256>}, {pipeline_mode = #tpu.pipeline_mode<synchronous>, transform_indices = @transform_1, window_bounds = array<i64: 16, 48>}, {transform_indices = @transform_2, window_bounds = array<i64: 16, 256>}, {transform_indices = @transform_3, window_bounds = array<i64: 1, 16, 2>}]} {
    %c0 = arith.constant 0 : index
    %c0_0 = arith.constant 0 : index
    %0 = vector.load %arg2[%c0, %c0_0] : memref<16x48xbf16, #tpu.memory_space<vmem>>, vector<16x48xbf16>
    %c0_1 = arith.constant 0 : index
    %c0_2 = arith.constant 0 : index
    %1 = vector.load %arg1[%c0_1, %c0_2] : memref<48x256xbf16, #tpu.memory_space<vmem>>, vector<48x256xbf16>
    %cst = arith.constant dense<0.000000e+00> : vector<16x256xf32>
    %2 = tpu.matmul %0, %1, %cst {dimension_numbers = #tpu.dot_dimension_numbers<[1], [0], [0], [1], [0, 0, 1, 1], [], []>} : vector<16x48xbf16>, vector<48x256xbf16>, vector<16x256xf32> -> vector<16x256xf32>
    %3 = arith.truncf %2 : vector<16x256xf32> to vector<16x256xbf16>
    %c0_3 = arith.constant 0 : index
    %c0_4 = arith.constant 0 : index
    %4 = vector.load %arg3[%c0_3, %c0_4] : memref<16x256xbf16, #tpu.memory_space<vmem>>, vector<16x256xbf16>
    tpu.vector_store %arg3[%c0_3, %c0_4], %3 {strides = array<i32>} : memref<16x256xbf16, #tpu.memory_space<vmem>>, vector<16x256xbf16>,
    %cst_5 = arith.constant dense<0.000000e+00> : vector<16xf32>
    %5 = vector.multi_reduction <add>, %2, %cst_5 [1] : vector<16x256xf32> to vector<16xf32>
    %6 = vector.shape_cast %5 : vector<16xf32> to vector<16x1xf32>
    %c0_6 = arith.constant 0 : index
    %c0_7 = arith.constant 0 : index
    %c0_8 = arith.constant 0 : index
    %7 = vector.load %arg4[%c0_6, %c0_7, %c0_8] : memref<1x16x2xf32, #tpu.memory_space<vmem>>, vector<1x16x1xf32>
    %8 = vector.shape_cast %7 : vector<1x16x1xf32> to vector<16x1xf32>
    %9 = vector.shape_cast %6 : vector<16x1xf32> to vector<1x16x1xf32>
    tpu.vector_store %arg4[%c0_6, %c0_7, %c0_8], %9 {strides = array<i32>} : memref<1x16x2xf32, #tpu.memory_space<vmem>>, vector<1x16x1xf32>,
    %10 = arith.mulf %2, %2 : vector<16x256xf32>
    %cst_9 = arith.constant dense<0.000000e+00> : vector<16xf32>
    %11 = vector.multi_reduction <add>, %10, %cst_9 [1] : vector<16x256xf32> to vector<16xf32>
    %12 = vector.shape_cast %11 : vector<16xf32> to vector<16x1xf32>
    %c0_10 = arith.constant 0 : index
    %c0_11 = arith.constant 0 : index
    %c1 = arith.constant 1 : index
    %13 = vector.load %arg4[%c0_10, %c0_11, %c1] : memref<1x16x2xf32, #tpu.memory_space<vmem>>, vector<1x16x1xf32>
    %14 = vector.shape_cast %13 : vector<1x16x1xf32> to vector<16x1xf32>
    %15 = vector.shape_cast %12 : vector<16x1xf32> to vector<1x16x1xf32>
    tpu.vector_store %arg4[%c0_10, %c0_11, %c1], %15 {strides = array<i32>} : memref<1x16x2xf32, #tpu.memory_space<vmem>>, vector<1x16x1xf32>,
    return
  }
  func.func @transform_0(%arg0: i32) -> (i32, i32) {
    %c0_i32 = arith.constant 0 : i32
    %c0_i32_0 = arith.constant 0 : i32
    return %c0_i32, %arg0 : i32, i32
  }
  func.func @transform_1(%arg0: i32) -> (i32, i32) {
    %c0_i32 = arith.constant 0 : i32
    %c0_i32_0 = arith.constant 0 : i32
    %c0_i32_1 = arith.constant 0 : i32
    return %c0_i32, %c0_i32_0 : i32, i32
  }
  func.func @transform_2(%arg0: i32) -> (i32, i32) {
    %c0_i32 = arith.constant 0 : i32
    %c0_i32_0 = arith.constant 0 : i32
    return %c0_i32, %arg0 : i32, i32
  }
  func.func @transform_3(%arg0: i32) -> (i32, i32, i32) {
    %c0_i32 = arith.constant 0 : i32
    %c0_i32_0 = arith.constant 0 : i32
    %c0_i32_1 = arith.constant 0 : i32
    return %arg0, %c0_i32, %c0_i32_0 : i32, i32, i32
  }
}

module attributes {stable_mosaic.version = 11 : i64} {
  func.func @_bn_relu_kernel(%arg0: i32, %arg1: memref<16x2xf32, #tpu.memory_space<vmem>>, %arg2: memref<16x256xbf16, #tpu.memory_space<vmem>>, %arg3: memref<16x256xf32, #tpu.memory_space<vmem>>) attributes {dimension_semantics = [#tpu.dimension_semantics<parallel>], iteration_bounds = array<i64: 2>, scalar_prefetch = 0 : i64, scratch_operands = 0 : i64, tpu.core_type = #tpu.core_type<tc>, window_params = [{pipeline_mode = #tpu.pipeline_mode<synchronous>, transform_indices = @transform_0, window_bounds = array<i64: 16, 2>}, {transform_indices = @transform_1, window_bounds = array<i64: 16, 256>}, {transform_indices = @transform_2, window_bounds = array<i64: 16, 256>}]} {
    %c0 = arith.constant 0 : index
    %c0_0 = arith.constant 0 : index
    %0 = vector.load %arg2[%c0, %c0_0] : memref<16x256xbf16, #tpu.memory_space<vmem>>, vector<16x256xbf16>
    %1 = arith.extf %0 : vector<16x256xbf16> to vector<16x256xf32>
    %c0_1 = arith.constant 0 : index
    %c0_2 = arith.constant 0 : index
    %2 = vector.load %arg1[%c0_1, %c0_2] : memref<16x2xf32, #tpu.memory_space<vmem>>, vector<16x1xf32>
    %3 = vector.broadcast %2 : vector<16x1xf32> to vector<16x256xf32>
    %4 = arith.mulf %1, %3 : vector<16x256xf32>
    %c0_3 = arith.constant 0 : index
    %c1 = arith.constant 1 : index
    %5 = vector.load %arg1[%c0_3, %c1] : memref<16x2xf32, #tpu.memory_space<vmem>>, vector<16x1xf32>
    %6 = vector.broadcast %5 : vector<16x1xf32> to vector<16x256xf32>
    %7 = arith.addf %4, %6 : vector<16x256xf32>
    %cst = arith.constant 0.000000e+00 : f32
    %8 = vector.broadcast %cst : f32 to vector<16x256xf32>
    %9 = arith.maximumf %7, %8 : vector<16x256xf32>
    %c0_4 = arith.constant 0 : index
    %c0_5 = arith.constant 0 : index
    %10 = vector.load %arg3[%c0_4, %c0_5] : memref<16x256xf32, #tpu.memory_space<vmem>>, vector<16x256xf32>
    tpu.vector_store %arg3[%c0_4, %c0_5], %9 {strides = array<i32>} : memref<16x256xf32, #tpu.memory_space<vmem>>, vector<16x256xf32>,
    return
  }
  func.func @transform_0(%arg0: i32) -> (i32, i32) {
    %c0_i32 = arith.constant 0 : i32
    %c0_i32_0 = arith.constant 0 : i32
    %c0_i32_1 = arith.constant 0 : i32
    return %c0_i32, %c0_i32_0 : i32, i32
  }
  func.func @transform_1(%arg0: i32) -> (i32, i32) {
    %c0_i32 = arith.constant 0 : i32
    %c0_i32_0 = arith.constant 0 : i32
    return %c0_i32, %arg0 : i32, i32
  }
  func.func @transform_2(%arg0: i32) -> (i32, i32) {
    %c0_i32 = arith.constant 0 : i32
    %c0_i32_0 = arith.constant 0 : i32
    return %c0_i32, %arg0 : i32, i32
  }
}

</mosaic_0001>

<bundles_post_ra>
// kernel: _conv_bn_relu_impl.2
= control target key start
LH: loop header
LB: loop body
LE: loop exit
PB: predicated region body
PF: predicated region fallthrough
CT: control target
= control target key end

     0   :  { %s611_s12 = smov 0   ;;  %s613_s13 = smov 0   ;;  %s679_s0 = inlined_call_operand.vmem [shape: bf16[48,512], index: 0, kind: input, shape index: {}]   ;;  %s680_s1 = inlined_call_operand.vmem [shape: bf16[16,48], index: 1, kind: input, shape index: {}]   ;;  %s681_s2 = inlined_call_operand.vmem [shape: bf16[16,512], index: 2, kind: output, shape index: {0}]   ;;  %s682_s3 = inlined_call_operand.vmem [shape: f32[2,16,2], index: 3, kind: output, shape index: {1}]  }
   0x1   :  { %s615_s14 = smov 0  }
   0x2 LB: > { %s627_s15 = sadd.s32 4294967295, %s588_s14   ;;  %s630_s16 = sadd.s32 1, %s588_s14   ;;  %s588_s14 = sphi %s615_s14, %s686_s14   ;;  %s584_s13 = sphi %s613_s13, %s685_s13   ;;  %s580_s12 = sphi %s611_s12, %s684_s12  }
   0x3   : > { %s18_s17 = ssub.s32 %s588_s14, %s630_s16  ;;  %s21_s18 = sadd.s32 1, %s584_s13 }
   0x4   : > { %p19_p0 = scmp.eq.s32.totalorder %s18_s17, 0  ;;  %p28_p1 = scmp.ne.s32.totalorder %s584_s13, %s580_s12 }
   0x5   : > { %p29_p2 = scmp.eq.s32.totalorder %s588_s14, 0  ;;  %p79_p3 = scmp.eq.s32.totalorder %s627_s15, 1 }
   0x6   : > { %s640_s19 = scalar_select %p19_p0, %s584_s13, %s21_s18  }
   0x7   : > { %p30_p4 = por %p29_p2, %p28_p1  ;;  %p642_p5 = por %p79_p3, %p28_p1 }
   0x8   : > { %p502_p6 = scmp.ge.s32.totalorder %s588_s14, 2 }
   0xa   : > { %130 = sbr.rel (%p502_p6) target bundleno = 22 (0x16), region = 20 }
   0xf   : > { %133 = sbr.rel (!%p30_p4) target bundleno = 22 (0x16), region = 24  ;;  %s135_s21 = sand.u32 (%p30_p4), 1, %s584_s13  }
  0x10   : > { %s524_s22 = sshll.u32 (%p30_p4), %s588_s14, 3  ;;  %s529_s23 = smul.u32 (%p30_p4), 48, %s135_s21 }
  0x11   : > { %s140_s26 = scalar_lea.vmem (%p30_p4), %s679_s0, %s524_s22 }
  0x12   : > { %v179_v0 = vld [vmem:[%s140_s26] sm:$0xff] (%p30_p4)  ;;  %v181_v1 = vld [vmem:[%s140_s26 + $0x10] sm:$0xff] (%p30_p4)  ;;  %s137_s27 = scalar_lea.vmem (%p30_p4), [#allocation2], %s529_s23 }
  0x13   : > { %v183_v2 = vld [vmem:[%s140_s26 + $0x20] sm:$0xff] (%p30_p4)  ;;  %v185_v3 = vld [vmem:[%s140_s26 + $0x30] sm:$0xff] (%p30_p4)  ;;  %180 = vst [vmem:[%s137_s27] sm:$0xff] (%p30_p4), %v179_v0  ;;  %182 = vst [vmem:[%s137_s27 + $0x8] sm:$0xff] (%p30_p4), %v181_v1 }
  0x14   : > { %v187_v4 = vld [vmem:[%s140_s26 + $0x40] sm:$0xff]  ;;  %v189_v5 = vld [vmem:[%s140_s26 + $0x50] sm:$0xff]  ;;  %184 = vst [vmem:[%s137_s27 + $0x10] sm:$0xff] %v183_v2  ;;  %186 = vst [vmem:[%s137_s27 + $0x18] sm:$0xff] %v185_v3 }
  0x15   : > { %188 = vst [vmem:[%s137_s27 + $0x20] sm:$0xff] %v187_v4  ;;  %190 = vst [vmem:[%s137_s27 + $0x28] sm:$0xff] %v189_v5 }
  0x16 PF: > { %p505_p7 = scmp.ge.s32.totalorder %s588_s14, 1  ;;  %p195_p8 = scmp.lt.s32.totalorder %s588_s14, 3 }
  0x18   : > { %p196_p9 = pnand %p505_p7, %p195_p8 }
  0x19   : > { %s202_s28 = sand.u32 (!%p196_p9), 1, %s580_s12   ;;  %p231_p10 = scmp.lt.s32.totalorder (!%p196_p9), %s627_s15, 1 }
  0x1a   : > { %199 = sbr.rel (%p196_p9) target bundleno = 386 (0x182), region = 62  ;;  %s506_s6 = sshll.u32 (!%p196_p9), %s202_s28, 4 }
  0x1b   : > { %s530_s29 = smul.u32 (!%p196_p9), 48, %s202_s28  ;;  %s221_s7 = scalar_lea.vmem (!%p196_p9), [#allocation3], %s506_s6 }
  0x1d   : > { %s204_s30 = scalar_lea.vmem (!%p196_p9), [#allocation2], %s530_s29 }
  0x1f   : > { %v590_v6 = vmov 0   ;;  %v556_v7 = vld [vmem:[%s204_s30 + $0x24] ss:$8 sps:$4 sm:$0xff]   ;;  %v558_v8 = vld [vmem:[%s204_s30 + $0x20] ss:$8 sps:$4 sm:$0xff]   ;;  %vm280_vm0 = vcmask 392192  }
  0x20   : > { %316 = vmatprep.mubr.bf16.mxu0 %v590_v6  ;;  %294 = vmatprep.subr.bf16.mxu0 %v556_v7  ;;  %v559_v9 = vld [vmem:[%s204_s30 + $0x14] ss:$8 sps:$4 sm:$0xff]   ;;  %v561_v10 = vld [vmem:[%s204_s30 + $0x10] ss:$8 sps:$4 sm:$0xff]   ;;  %v562_v11 = vld [vmem:[%s204_s30 + $0x4] ss:$8 sps:$4 sm:$0xff]  }
  0x21   : > { %295 = vmatpush1.bf16.msra.mxu0 %v558_v8  ;;  %v564_v12 = vld [vmem:[%s204_s30] ss:$8 sps:$4 sm:$0xff]   ;;  %s232_s8 = scalar_select %p231_p10, %s627_s15, 1  ;;  %vm347_vm1 = vcmask 7168   ;;  %vm360_vm2 = vcmask 15368  }
  0x22   : > { %296 = vmatprep.subr.bf16.mxu0 %v559_v9  ;;  %v565_v13 = vld [vmem:[%s680_s1] sm:$0xff]   ;;  %s528_s14 = sshll.u32 (%p642_p5), %s627_s15, 3 }
  0x23   : > { %s525_s9 = sshll.u32 %s232_s8, 4  ;;  %s377_s21 = scalar_lea.vmem (%p642_p5), %s681_s2, %s528_s14 }
  0x24   : > { %s235_s12 = scalar_lea.vmem %s682_s3, %s525_s9 }
  0x25   : > { %297 = vmatpush1.bf16.msra.mxu0 %v561_v10 }
  0x26   : > { %298 = vmatprep.subr.bf16.mxu0 %v562_v11 }
  0x29   : > { %299 = vmatpush1.bf16.msra.mxu0 %v564_v12 }
  0x2c   : > { %516 = vmatmul.mubr.msk.bf16.vlgmr.msra.gmra.mxu0 %vm280_vm0, %v565_v13 }
  0xec   : > { %v318_v14 = vpop.f32.mrf.mxu0 }
  0xed   : > { %v350_v18 = vmul.f32 %v318_v14, %v318_v14 }
  0xee   : > { %v320_v15 = vpop.f32.mrf.mxu0 }
  0xef   : > { %v526_v16 = vpack.c.bf16 %v320_v15, %v318_v14  ;;  %v341_v17 = vadd.f32 %v320_v15, %v318_v14  ;;  %v351_v19 = vmul.f32 %v320_v15, %v320_v15 }
  0xf0   : > { %v322_v20 = vpop.f32.mrf.mxu0 }
  0xf1   : > { %342 = vadd.xlane.f32.xlu0 %v341_v17  ;;  %339 = vst [vmem:[%s221_s7] sm:$0xff] %v526_v16  ;;  %v354_v21 = vadd.f32 %v351_v19, %v350_v18  ;;  %v352_v26 = vmul.f32 %v322_v20, %v322_v20 }
  0xf2   : > { %v324_v22 = vpop.f32.mrf.mxu0 }
  0xf3   : > { %v527_v23 = vpack.c.bf16 %v324_v22, %v322_v20  ;;  %v353_v24 = vmul.f32 %v324_v22, %v324_v22  ;;  %355 = vadd.xlane.f32.xlu1 %v354_v21  ;;  %v344_v25 = vadd.f32 %v324_v22, %v322_v20 }
  0xf5   : > { %340 = vst [vmem:[%s221_s7 + $0x8] sm:$0xff] %v527_v23  ;;  %345 = vadd.xlane.f32.xlu0 %v344_v25  ;;  %v357_v27 = vadd.f32 %v353_v24, %v352_v26 }
  0xf7   : > { %358 = vadd.xlane.f32.xlu1 %v357_v27 }
  0xf8   : > { %v408_v32 = vld [vmem:[%s221_s7] sm:$0xff] (%p642_p5) }
  0xf9   : > { %409 = vst [vmem:[%s377_s21] sm:$0xff] (%p642_p5), %v408_v32 }
  0xfc   : > { %v410_v33 = vld [vmem:[%s221_s7 + $0x8] sm:$0xff] (%p642_p5) }
  0xfd   : > { %411 = vst [vmem:[%s377_s21 + $0x10] sm:$0xff] (%p642_p5), %v410_v33 }
 0x17a   : > { %v343_v28 = vpop.xlane.xlu0 %342 }
 0x17b   : > { %348 = vst.msk [vmem:[%s235_s12] sm:$0xff] %vm347_vm1, %v343_v28 }
 0x17c   : > { %v356_v29 = vpop.xlane.xlu1 %355 }
 0x17d   : > { %361 = vst.msk [vmem:[%s235_s12] sm:$0xff] %vm360_vm2, %v356_v29  ;;  %374 = sbr.rel (!%p642_p5) target bundleno = 386 (0x182), region = 70 }
 0x17e   : > { %v346_v30 = vpop.xlane.xlu0 %345 }
 0x17f   : > { %349 = vst.msk [vmem:[%s235_s12 + $0x8] sm:$0xff] %vm347_vm1, %v346_v30 }
 0x180   : > { %v359_v31 = vpop.xlane.xlu1 %358 }
 0x181   : > { %362 = vst.msk [vmem:[%s235_s12 + $0x8] sm:$0xff] %vm360_vm2, %v359_v31 }
 0x182 PF: > { %p11_p11 = scmp.ge.s32.totalorder %s630_s16, 4   ;;  %s684_s12 = smov %s584_s13 }
 0x183   : > { %s685_s13 = smov %s640_s19  ;;  %s686_s14 = smov %s630_s16 }
 0x184   :  { %13 = sbr.rel (!%p11_p11) target bundleno = 2 (0x2), region = 151 }

// kernel: _conv_bn_relu_impl.3
= control target key start
LH: loop header
LB: loop body
LE: loop exit
PB: predicated region body
PF: predicated region fallthrough
CT: control target
= control target key end

     0   :  { %s398_s9 = smov 0   ;;  %s400_s10 = smov 0   ;;  %s464_s0 = inlined_call_operand.vmem [shape: f32[16,2], index: 0, kind: input, shape index: {}]   ;;  %s465_s1 = inlined_call_operand.vmem [shape: bf16[16,512], index: 1, kind: input, shape index: {}]   ;;  %s466_s2 = inlined_call_operand.vmem [shape: f32[16,512], index: 2, kind: output, shape index: {}]  }
   0x1   :  { %s402_s11 = smov 0  }
   0x2 LB: > { %s311_s12 = sadd.s32 4294967295, %s379_s11   ;;  %s415_s13 = sadd.s32 1, %s379_s11   ;;  %s379_s11 = sphi %s402_s11, %s470_s11   ;;  %s375_s10 = sphi %s400_s10, %s469_s10   ;;  %s371_s9 = sphi %s398_s9, %s468_s9  }
   0x3   : > { %s37_s14 = ssub.s32 %s379_s11, %s415_s13  ;;  %s40_s15 = sadd.s32 1, %s375_s10 }
   0x4   : > { %p38_p0 = scmp.eq.s32.totalorder %s37_s14, 0  ;;  %p47_p1 = scmp.ne.s32.totalorder %s375_s10, %s371_s9 }
   0x5   : > { %p48_p2 = scmp.eq.s32.totalorder %s379_s11, 0  ;;  %p77_p3 = scmp.eq.s32.totalorder %s311_s12, 1 }
   0x6   : > { %s426_s16 = scalar_select %p38_p0, %s375_s10, %s40_s15  }
   0x7   : > { %p49_p4 = por %p48_p2, %p47_p1  ;;  %p428_p5 = por %p77_p3, %p47_p1 }
   0x8   : > { %p314_p6 = scmp.ge.s32.totalorder %s379_s11, 2 }
   0xa   : > { %102 = sbr.rel (%p314_p6) target bundleno = 20 (0x14), region = 20 }
   0xf   : > { %105 = sbr.rel (!%p49_p4) target bundleno = 20 (0x14), region = 24  ;;  %s107_s18 = sand.u32 (%p49_p4), 1, %s375_s10  }
  0x10   : > { %s326_s19 = sshll.u32 (%p49_p4), %s379_s11, 3  ;;  %s315_s20 = sshll.u32 (%p49_p4), %s107_s18, 4 }
  0x11   : > { %s112_s23 = scalar_lea.vmem (%p49_p4), %s465_s1, %s326_s19  ;;  %s109_s24 = scalar_lea.vmem (%p49_p4), [#allocation2], %s315_s20 }
  0x12   : > { %v143_v0 = vld [vmem:[%s112_s23] sm:$0xff] (%p49_p4)  ;;  %v145_v1 = vld [vmem:[%s112_s23 + $0x10] sm:$0xff] (%p49_p4) }
  0x13   : > { %144 = vst [vmem:[%s109_s24] sm:$0xff] (%p49_p4), %v143_v0  ;;  %146 = vst [vmem:[%s109_s24 + $0x8] sm:$0xff] (%p49_p4), %v145_v1 }
  0x14 PF: > { %p318_p7 = scmp.ge.s32.totalorder %s379_s11, 1  ;;  %p151_p8 = scmp.lt.s32.totalorder %s379_s11, 3 }
  0x16   : > { %p152_p9 = pnand %p318_p7, %p151_p8 }
  0x17   : > { %s158_s29 = sand.u32 (!%p152_p9), 1, %s371_s9  }
  0x18   : > { %155 = sbr.rel (%p152_p9) target bundleno = 174 (0xae), region = 62  ;;  %s319_s30 = sshll.u32 (!%p152_p9), %s158_s29, 4 }
  0x19   : > { %s160_s3 = scalar_lea.vmem (!%p152_p9), [#allocation2], %s319_s30  ;;  %s320_s4 = sshll.u32 (!%p152_p9), %s158_s29, 5 }
  0x1a   : > { %s177_s5 = scalar_lea.vmem (!%p152_p9), [#allocation3], %s320_s4 }
  0x1d   : > { %v186_v2 = vld [vmem:[%s464_s0] sm:$0xff]  ;;  %v381_v3 = vmov 1   ;;  %v382_v4 = vmov 0   ;;  %v187_v5 = vld [vmem:[%s464_s0 + $0x8] sm:$0xff]  ;;  %s327_s6 = sshll.u32 (%p428_p5), %s311_s12, 4 }
  0x1e   : > { %355 = vset.pattern.permute.xlu1 %v381_v3  ;;  %354 = vset.pattern.permute.xlu0 %v382_v4  ;;  %v180_v6 = vld [vmem:[%s160_s3] sm:$0xff]  ;;  %v181_v9 = vld [vmem:[%s160_s3 + $0x8] sm:$0xff]  ;;  %s231_s9 = scalar_lea.vmem (%p428_p5), %s466_s2, %s327_s6 }
  0x1f   : > { %203 = vperm.xlu1 %355, %v186_v2   ;;  %190 = vperm.xlu0 %354, %v186_v2   ;;  %v182_v7 = vunpack.c.l.bf16 %v180_v6  ;;  %v183_v8 = vunpack.c.h.bf16 %v180_v6  ;;  %v184_v14 = vunpack.c.l.bf16 %v181_v9  ;;  %v185_v15 = vunpack.c.h.bf16 %v181_v9 }
  0x23   : > { %207 = vperm.xlu1 %355, %v187_v5   ;;  %195 = vperm.xlu0 %354, %v187_v5  }
  0x27   : > { %356 = vset.pattern.permute.xlu0 %v381_v3 }
  0x9a   : > { %v204_v10 = vpop.permute.xlu1 %203  ;;  %v191_v11 = vpop.permute.xlu0 %190 }
  0x9b   : > { %v198_v12 = vmul.f32 %v191_v11, %v182_v7  ;;  %v199_v13 = vmul.f32 %v191_v11, %v183_v8 }
  0x9d   : > { %v210_v16 = vadd.f32 %v204_v10, %v198_v12  ;;  %v211_v17 = vadd.f32 %v204_v10, %v199_v13 }
  0x9e   : > { %v196_v18 = vpop.permute.xlu0 %195  ;;  %v208_v23 = vpop.permute.xlu1 %207 }
  0x9f   : > { %v214_v19 = vmax.f32 %v210_v16, 0.0  ;;  %v215_v20 = vmax.f32 %v211_v17, 0.0  ;;  %v200_v21 = vmul.f32 %v196_v18, %v184_v14  ;;  %v201_v22 = vmul.f32 %v196_v18, %v185_v15 }
  0xa1   : > { %218 = vst [vmem:[%s177_s5] sm:$0xff] %v214_v19  ;;  %219 = vst [vmem:[%s177_s5 + $0x8] sm:$0xff] %v215_v20  ;;  %v212_v24 = vadd.f32 %v208_v23, %v200_v21  ;;  %v213_v25 = vadd.f32 %v208_v23, %v201_v22  ;;  %228 = sbr.rel (!%p428_p5) target bundleno = 174 (0xae), region = 70 }
  0xa3   : > { %v216_v26 = vmax.f32 %v212_v24, 0.0  ;;  %v217_v27 = vmax.f32 %v213_v25, 0.0 }
  0xa5   : > { %220 = vst [vmem:[%s177_s5 + $0x10] sm:$0xff] %v216_v26  ;;  %221 = vst [vmem:[%s177_s5 + $0x18] sm:$0xff] %v217_v27 }
  0xa8   : > { %v244_v28 = vld [vmem:[%s177_s5] sm:$0xff]  ;;  %v246_v29 = vld [vmem:[%s177_s5 + $0x8] sm:$0xff] }
  0xa9   : > { %245 = vst [vmem:[%s231_s9] sm:$0xff] %v244_v28  ;;  %247 = vst [vmem:[%s231_s9 + $0x8] sm:$0xff] %v246_v29 }
  0xac   : > { %v248_v30 = vld [vmem:[%s177_s5 + $0x10] sm:$0xff]  ;;  %v250_v31 = vld [vmem:[%s177_s5 + $0x18] sm:$0xff] }
  0xad   : > { %249 = vst [vmem:[%s231_s9 + $0x20] sm:$0xff] %v248_v30  ;;  %251 = vst [vmem:[%s231_s9 + $0x28] sm:$0xff] %v250_v31 }
  0xae PF: > { %p9_p10 = scmp.ge.s32.totalorder %s415_s13, 4   ;;  %s468_s9 = smov %s375_s10 }
  0xaf   : > { %s469_s10 = smov %s426_s16  ;;  %s470_s11 = smov %s415_s13 }
  0xb0   :  { %11 = sbr.rel (!%p9_p10) target bundleno = 2 (0x2), region = 124 }

</bundles_post_ra>
